<compile_context>
chip_gen: v5e
topology: v5e:2x2
jax: 0.10.0
libtpu: 0.0.40
codegen_flags: <defaults>
</compile_context>

<pallas_src>
import math
import functools

import jax
import jax.numpy as jnp
from jax import lax
from jax.experimental import pallas as pl
from jax.experimental.pallas import tpu as pltpu


def _lowbias32(h):
    """Cheap uint32 avalanche hash (lowbias32) using plain VPU integer ops."""
    h = (h ^ (h >> 16)) * jnp.uint32(0x7FEB352D)
    h = (h ^ (h >> 15)) * jnp.uint32(0x846CA68B)
    return h ^ (h >> 16)


def _pos_enc_kernel(seed_ref, x_ref, pe_ref, out_ref, *, p, training, elems_per_batch):
    # seed_ref : (1,)          int32  SMEM (scalar prefetch)
    # x_ref    : (ts, E_eff)   VMEM   (batch dim squeezed)
    # pe_ref   : (ts, E_eff)   VMEM   (resident across the inner batch axis)
    # out_ref  : (ts, E_eff)   VMEM
    y = x_ref[...] + pe_ref[...]

    if training and p > 0.0:
        ts_blk, ecols = y.shape
        i = pl.program_id(0)      # seq-tile index (outer grid axis)
        b = pl.program_id(1)      # batch index    (inner grid axis)
        # Global flat element index b*S*E + s*E + e: mask is invariant to tile
        # size, grid order and the lane-folding reshape in the wrapper.
        rows = lax.broadcasted_iota(jnp.uint32, (ts_blk, ecols), 0)
        cols = lax.broadcasted_iota(jnp.uint32, (ts_blk, ecols), 1)
        row0 = lax.convert_element_type(i * ts_blk, jnp.uint32)
        base = lax.convert_element_type(b, jnp.uint32) * jnp.uint32(
            elems_per_batch & 0xFFFFFFFF)
        gidx = base + (row0 + rows) * jnp.uint32(ecols) + cols
        seed = lax.convert_element_type(seed_ref[0], jnp.uint32)
        h = _lowbias32(gidx ^ (seed * jnp.uint32(0x9E3779B9)))
        # drop iff h < p * 2^32 (unsigned compare); keep-prob = 1 - p
        thr = jnp.uint32(min(int(round(p * (2.0 ** 32))), 2 ** 32 - 1))
        keep = h >= thr
        y = jnp.where(keep, y * (1.0 / (1.0 - p)), 0.0)

    out_ref[...] = y.astype(out_ref.dtype)


def make_pe_table(max_len, embed_size, dtype=jnp.float32):
    """Same buffer as the torch module (even embed_size assumed)."""
    position = jnp.arange(max_len, dtype=jnp.float32)[:, None]            # (L, 1)
    div_term = jnp.exp(
        jnp.arange(0, embed_size, 2, dtype=jnp.float32)
        * (-(math.log(10000.0) / embed_size))
    )                                                                     # (E/2,)
    args = position * div_term                                            # (L, E/2)
    # interleave: pe[:, 0::2] = sin, pe[:, 1::2] = cos
    pe = jnp.stack([jnp.sin(args), jnp.cos(args)], axis=-1).reshape(max_len, embed_size)
    return pe.astype(dtype)


def positional_encoding(x, pe_table, *, dropout_p=0.0, training=False, seed=0, ts=None):
    """x: [B, S, E], pe_table: [max_len, E] -> [B, S, E] (x + PE, then dropout)."""
    B, S, E = x.shape
    L, Ep = pe_table.shape
    assert L >= S and Ep == E
    assert 0.0 <= dropout_p < 1.0

    # Store the table in the compute dtype at build time; cast only as fallback.
    if pe_table.dtype != x.dtype:
        pe_table = pe_table.astype(x.dtype)

    # Lane density: if E is not a multiple of 128, fold g consecutive seq
    # positions into the lane dim (free, layout-preserving reshape) so stores
    # are full-width 128-lane vst's. Fall back to plain layout otherwise.
    g = 1
    if E % 128 != 0:
        gc = 128 // math.gcd(E, 128)
        if S % gc == 0 and L % gc == 0 and (S // gc) >= 8:
            g = gc
    S_eff, E_eff, L_eff = S // g, E * g, L // g
    x_eff = x if g == 1 else x.reshape(B, S_eff, E_eff)
    pe_eff = pe_table if g == 1 else pe_table.reshape(L_eff, E_eff)

    itemsize = jnp.dtype(x.dtype).itemsize
    align = max(8, 32 // itemsize)                 # sublane packing: 8 f32 / 16 bf16

    # Seq-tile rows from a VMEM budget: 3 streams (x, pe, out) x 2 pipeline
    # buffers x ts*E_eff*itemsize bytes. Keeps large slabs without OOM on
    # v7x's 64 MiB VMEM or v5e's 16 MiB default scoped limit.
    vmem_budget = 32 * 1024 * 1024
    ts_cap = max(align, (vmem_budget // (6 * E_eff * itemsize)) // align * align)
    if ts is None:
        ts = min(ts_cap, 512)
    if S_eff >= align:
        ts = min(ts, (S_eff // align) * align)     # multiple of align; ragged tail OK
    else:
        ts = S_eff                                 # tiny-S fallback: block == full dims
        pe_eff = pe_eff[:S_eff]                    # few rows; keeps pe block full-dim
    num_tiles = pl.cdiv(S_eff, ts)

    seed_arr = jnp.asarray([seed], dtype=jnp.int32)
    kernel = functools.partial(
        _pos_enc_kernel,
        p=float(dropout_p),
        training=bool(training),
        elems_per_batch=S * E,
    )

    out = pl.pallas_call(
        kernel,
        out_shape=jax.ShapeDtypeStruct((B, S_eff, E_eff), x.dtype),
        grid_spec=pltpu.PrefetchScalarGridSpec(
            num_scalar_prefetch=1,                 # seed -> SMEM
            # Batch is the inner (fastest) axis: pe's block index is constant
            # across it, so the pe tile stays resident in VMEM.
            grid=(num_tiles, B),
            in_specs=[
                pl.BlockSpec((None, ts, E_eff), lambda i, b, s: (b, i, 0)),
                pl.BlockSpec((ts, E_eff), lambda i, b, s: (i, 0)),
            ],
            out_specs=pl.BlockSpec((None, ts, E_eff), lambda i, b, s: (b, i, 0)),
        ),
        compiler_params=pltpu.CompilerParams(
            # seq tiles shard across TCs (v7x megacore); batch kept "arbitrary"
            # so the per-core iteration order preserves pe residency.
            dimension_semantics=("parallel", "arbitrary"),
            vmem_limit_bytes=48 * 1024 * 1024,
        ),
    )(seed_arr, x_eff, pe_eff)

    return out if g == 1 else out.reshape(B, S, E)


if __name__ == "__main__":
    # Small deterministic setup consistent with the module: batch=2, seq=8, embed=32
    embed_size = 32
    max_len = 64
    batch, seq = 2, 8
    dropout_p = 0.1

    key = jax.random.PRNGKey(0)
    x = jax.random.normal(key, (batch, seq, embed_size), dtype=jnp.float32)
    pe = make_pe_table(max_len, embed_size)

    # --- eval mode: dropout is identity, exact check vs pure-JAX reference ---
    out_eval = positional_encoding(x, pe, dropout_p=dropout_p, training=False)
    out_eval = jax.block_until_ready(out_eval)
    ref = x + pe[None, :seq, :]
    assert out_eval.shape == (batch, seq, embed_size)
    assert jnp.allclose(out_eval, ref, atol=1e-6, rtol=1e-6)

    # --- training mode: dropout via in-kernel counter-hash PRNG (structural check) ---
    # TODO(synk): torch's dropout RNG stream cannot be reproduced; mask differs.
    out_train = positional_encoding(x, pe, dropout_p=dropout_p, training=True, seed=0)
    out_train = jax.block_until_ready(out_train)
    scaled = ref / (1.0 - dropout_p)
    dropped = out_train == 0.0
    # every kept element equals (x + pe) / (1 - p)
    assert jnp.allclose(
        jnp.where(dropped, 0.0, out_train),
        jnp.where(dropped, 0.0, scaled),
        atol=1e-5, rtol=1e-5,
    )
    drop_frac = float(jnp.mean(dropped.astype(jnp.float32)))
    assert 0.0 <= drop_frac <= 0.4  # p=0.1 over 512 elems -> generously bounded

    print("KERNEL_OK")
</pallas_src>

<mosaic_0001>
module attributes {stable_mosaic.version = 11 : i64} {
  func.func @_pos_enc_kernel(%arg0: i32, %arg1: i32, %arg2: memref<1xi32, #tpu.memory_space<smem>>, %arg3: memref<1x8x32xf32, #tpu.memory_space<vmem>>, %arg4: memref<8x32xf32, #tpu.memory_space<vmem>>, %arg5: memref<1x8x32xf32, #tpu.memory_space<vmem>>) attributes {dimension_semantics = [#tpu.dimension_semantics<parallel>, #tpu.dimension_semantics<arbitrary>], iteration_bounds = array<i64: 1, 2>, scalar_prefetch = 1 : i64, scratch_operands = 0 : i64, tpu.core_type = #tpu.core_type<tc>, window_params = [{transform_indices = @transform_0, window_bounds = array<i64: 1, 8, 32>}, {transform_indices = @transform_1, window_bounds = array<i64: 8, 32>}, {transform_indices = @transform_2, window_bounds = array<i64: 1, 8, 32>}]} {
    %c0 = arith.constant 0 : index
    %c0_0 = arith.constant 0 : index
    %c0_1 = arith.constant 0 : index
    %0 = vector.load %arg3[%c0, %c0_0, %c0_1] : memref<1x8x32xf32, #tpu.memory_space<vmem>>, vector<1x8x32xf32>
    %1 = vector.shape_cast %0 : vector<1x8x32xf32> to vector<8x32xf32>
    %c0_2 = arith.constant 0 : index
    %c0_3 = arith.constant 0 : index
    %2 = vector.load %arg4[%c0_2, %c0_3] : memref<8x32xf32, #tpu.memory_space<vmem>>, vector<8x32xf32>
    %3 = arith.addf %1, %2 : vector<8x32xf32>
    %c0_4 = arith.constant 0 : index
    %c0_5 = arith.constant 0 : index
    %c0_6 = arith.constant 0 : index
    %4 = vector.load %arg5[%c0_4, %c0_5, %c0_6] : memref<1x8x32xf32, #tpu.memory_space<vmem>>, vector<1x8x32xf32>
    %5 = vector.shape_cast %4 : vector<1x8x32xf32> to vector<8x32xf32>
    %6 = vector.shape_cast %3 : vector<8x32xf32> to vector<1x8x32xf32>
    tpu.vector_store %arg5[%c0_4, %c0_5, %c0_6], %6 {strides = array<i32>} : memref<1x8x32xf32, #tpu.memory_space<vmem>>, vector<1x8x32xf32>,
    return
  }
  func.func @transform_0(%arg0: i32, %arg1: i32, %arg2: memref<1xi32, #tpu.memory_space<smem>>) -> (i32, i32, i32) {
    %c0_i32 = arith.constant 0 : i32
    %c0_i32_0 = arith.constant 0 : i32
    return %arg1, %arg0, %c0_i32 : i32, i32, i32
  }
  func.func @transform_1(%arg0: i32, %arg1: i32, %arg2: memref<1xi32, #tpu.memory_space<smem>>) -> (i32, i32) {
    %c0_i32 = arith.constant 0 : i32
    %c0_i32_0 = arith.constant 0 : i32
    return %arg0, %c0_i32 : i32, i32
  }
  func.func @transform_2(%arg0: i32, %arg1: i32, %arg2: memref<1xi32, #tpu.memory_space<smem>>) -> (i32, i32, i32) {
    %c0_i32 = arith.constant 0 : i32
    %c0_i32_0 = arith.constant 0 : i32
    return %arg1, %arg0, %c0_i32 : i32, i32, i32
  }
}

</mosaic_0001>

<bundles_post_ra>
// kernel: tpu_custom_call.1
= control target key start
LH: loop header
LB: loop body
LE: loop exit
PB: predicated region body
PF: predicated region fallthrough
CT: control target
= control target key end

     0   :  { %9 = vsyncpa [#allocation5], 0  ;;  %s553_s0 = inlined_call_operand.<no memory space> [shape: s32[1], index: 0, kind: input, shape index: {}]   ;;  %s554_s1 = inlined_call_operand.vmem [shape: f32[2,8,32], index: 1, kind: input, shape index: {}]   ;;  %s555_s2 = inlined_call_operand.vmem [shape: f32[64,32], index: 2, kind: input, shape index: {}]   ;;  %s556_s3 = inlined_call_operand.hbm [shape: f32[2,8,32], index: 3, kind: output, shape index: {}]  }
   0x1   :  { %11 = vsyncpa [#allocation5 + $0x1], 0  ;;  %s458_s12 = smov 0   ;;  %s460_s13 = smov 0  }
   0x2   :  { %s462_s14 = smov 0   ;;  %s464_s15 = smov 0  }
   0x3   :  { %s466_s0 = smov 0   ;;  %s468_s16 = smov 0  }
   0x4 LB: > { %s291_s17 = sadd.s32 4294967295, %s436_s16   ;;  %s292_s18 = sadd.s32 4294967294, %s436_s16   ;;  %s436_s16 = sphi %s468_s16, %s17_s16   ;;  %s432_s0 = sphi %s466_s0, %s563_s0   ;;  %s428_s15 = sphi %s464_s15, %s562_s15   ;;  %s424_s14 = sphi %s462_s14, %s561_s14   ;;  %s420_s13 = sphi %s460_s13, %s560_s13   ;;  %s416_s12 = sphi %s458_s12, %s559_s12  }
   0x5   : > { %s26_s19 = sadd.s32 1, %s432_s0  ;;  %s92_s20 = sadd.s32 1, %s424_s14 }
   0x6   : > { %p27_p0 = scmp.ge.s32.totalorder %s26_s19, 2  ;;  %p102_p1 = scmp.ne.s32.totalorder %s424_s14, %s420_s13 }
   0x7   : > { %p103_p2 = scmp.eq.s32.totalorder %s291_s17, 1  ;;  %p108_p3 = scmp.ne.s32.totalorder %s420_s13, %s416_s12 }
   0x8   : > { %s565_s19 = smov (%p27_p0, %s26_s19), 0  ;;  %p109_p5 = scmp.eq.s32.totalorder %s292_s18, 1 }
   0x9   : > { %p496_p4 = por %p103_p2, %p102_p1  ;;  %s87_s22 = ssub.s32 %s432_s0, %s565_s19 }
   0xa   : > { %p296_p6 = scmp.ge.s32.totalorder %s436_s16, 1  ;;  %p90_p7 = scmp.eq.s32.totalorder %s87_s22, 0 }
   0xb   : > { %p503_p8 = por %p109_p5, %p108_p3  ;;  %p144_p9 = scmp.lt.s32.totalorder %s436_s16, 3 }
   0xc   : > { %s509_s24 = scalar_select %p90_p7, %s424_s14, %s92_s20  }
   0xd   : > { %p145_p10 = pnand %p296_p6, %p144_p9 }
   0xe   : > { %s169_s25 = sand.u32 (!%p145_p10), 1, %s420_s13   ;;  %p172_p11 = scmp.lt.s32.totalorder (!%p145_p10), %s428_s15, 1 }
   0xf   : > { %148 = sbr.rel (%p145_p10) target bundleno = 33 (0x21), region = 28  ;;  %s297_s26 = sshll.u32 (!%p145_p10), %s169_s25, 3 }
  0x10   : > { %s300_s27 = sshll.u32 (!%p145_p10), %s428_s15, 3  ;;  %s171_s7 = scalar_lea.vmem (!%p145_p10), [#allocation4], %s297_s26 }
  0x11   : > { %s200_s30 = scalar_lea.hbm (!%p145_p10), %s556_s3, %s300_s27  ;;  %s202_s8 = sshll.u32 (!%p145_p10), %s171_s7, 4  ;;  %s203_s8 = int_to_ptr.vmem [resolvable:$true] %s202_s8 }
  0x12   : > { %s204_s17 = sshll.u32 (!%p145_p10), %s200_s30, 4  ;;  %s189_s18 = scalar_lea.sflag (!%p145_p10), [#allocation5], %s169_s25  ;;  %s205_s17 = int_to_ptr.hbm [resolvable:$true] %s204_s17 }
  0x13   : > { %s378_s27 = scalar_lea.hbm (!%p145_p10), %s556_s3, 16 }
  0x14   : > { %s567_s15 = smov (!%p172_p11, %s428_s15), 1  ;;  %v184_v0 = vld [vmem:[%s555_s2] sm:$0xff]  ;;  %vm186_vm0 = vcmask 261120  }
  0x15   : > { %s298_s4 = sshll.u32 %s567_s15, 3  ;;  %s372_s15 = sshra.s32 %s205_s17, 4  ;;  %s373_s15 = int_to_ptr.hbm [resolvable:$true] %s372_s15 }
  0x16   : > { %s178_s11 = scalar_lea.vmem %s554_s1, %s298_s4  ;;  %s374_s20 = scalar_lea.hbm %s373_s15, 8 }
  0x17   : > { %v183_v1 = vld [vmem:[%s178_s11] sm:$0xff]  ;;  %p375_p12 = scmp.ne.s32.totalorder %s373_s15, %s374_s20  ;;  %p379_p1 = scmp.lt.s32.totalorder %s373_s15, %s556_s3 }
  0x18   : > { %v185_v2 = vadd.f32 %v184_v0, %v183_v1  ;;  %p380_p2 = scmp.lt.s32.totalorder %s378_s27, %s374_s20 }
  0x19   : > { %p376_p13 = pnand %p375_p12, %p496_p4 }
  0x1a   : > { %187 = vst.msk [vmem:[%s171_s7] sm:$0xff] %vm186_vm0, %v185_v2  ;;  %p381_p3 = por %p380_p2, %p379_p1 }
  0x1b   : > { %p377_p0 = pneg %p376_p13 }
  0x1d   : > { %p382_p5 = pnand %p381_p3, %p377_p0 }
  0x1f   : > { %385 = shalt.err (!%p382_p5)
}
  0x20   : > { %303 = dma.vmem_to_hbm [thread:$0]  (%p496_p4), %s203_s8, 128, %s205_s17, %s189_s18  }
  0x21 PF: > { %p309_p6 = scmp.ge.s32.totalorder %s436_s16, 2  ;;  %s216_s25 = sand.u32 1, %s416_s12  }
  0x22   : > { %s217_s30 = scalar_lea.sflag [#allocation5], %s216_s25 }
  0x23   : > { %p306_p7 = pnand %p309_p6, %p503_p8 }
  0x25   : > { %p307_p9 = pneg %p306_p7 }
  0x27   : > { %411 = dma.done.wait (%p307_p9), %s217_s30, 128  }
  0x28   : > { %413 = vsyncadd (%p307_p9), %s217_s30, 4294967168  ;;  %s17_s16 = sadd.s32 1, %s436_s16   ;;  %s559_s12 = smov %s420_s13 }
  0x29   : > { %p14_p10 = scmp.ge.s32.totalorder %s17_s16, 4   ;;  %s560_s13 = smov %s424_s14 }
  0x2a   : > { %s561_s14 = smov %s509_s24  ;;  %s562_s15 = smov %s432_s0 }
  0x2b   : > { %s563_s0 = smov %s565_s19  ;;  %16 = sbr.rel (!%p14_p10) target bundleno = 4 (0x4), region = 66 }
  0x30   :  { %223 = vsyncpa [#allocation5], 1 }
  0x31   :  { %225 = vsyncpa [#allocation5 + $0x1], 1 }

</bundles_post_ra>
